<compile_context>
chip_gen: v6e
topology: v6e:2x2x1
jax: 0.10.0
libtpu: 0.0.40
codegen_flags: <defaults>
</compile_context>

<pallas_src>
import functools
import math

import jax
import jax.numpy as jnp
from jax.experimental import pallas as pl
from jax.experimental.pallas import tpu as pltpu


# Approx. VMEM bytes needed per input element in a block: native stream
# (double buffered) + f32 copy + rolled neighbors + diff/contrib temporaries.
_WORKSET_BYTES_PER_ELEM = 32


def _ceil_div(a, b):
    return -(-a // b)


def _round_up(a, m):
    return _ceil_div(a, m) * m


def _vmem_capacity_bytes():
    try:
        cap = getattr(pltpu.get_tpu_info(), "vmem_capacity_bytes", None)
        if cap:
            return int(cap)
    except Exception:
        pass
    return 64 * 1024 * 1024  # conservative fallback (v7x per-core VMEM)


def _tv_kernel_flat(x_ref, m_ref, o_ref, *, w, ragged, n_rows):
    """Lane-dense path: x_ref is a (block_rows, H*W) tile of the (B*C, H*W) view.

    m_ref is the resident (2, H*W) mask with scale_h / scale_w folded in.
    """
    block_rows, hw = x_ref.shape
    x = x_ref[...].astype(jnp.float32)
    if ragged:  # compiled in only when the grid has a padded tail tile
        row = jax.lax.broadcasted_iota(jnp.int32, (block_rows, 1), 0)
        x = jnp.where(row + pl.program_id(0) * block_rows < n_rows, x, 0.0)
    m = m_ref[...]
    # Neighbors via lane rotation (jnp.roll semantics):
    #   down[k]  = x[(k + w) % hw]   (vertical neighbor)
    #   right[k] = x[(k + 1) % hw]   (horizontal neighbor)
    # wrap-around / row-boundary positions carry a zero in the masks.
    down = pltpu.roll(x, hw - w, axis=1)
    right = pltpu.roll(x, hw - 1, axis=1)
    dh = down - x
    dw = right - x
    contrib = dh * dh * m[0:1, :] + dw * dw * m[1:2, :]
    if block_rows % 8 == 0:
        part = contrib.reshape(block_rows // 8, 8, hw).sum(axis=0)   # (8, hw)
    else:
        part = contrib.sum(axis=0, keepdims=True)                    # (1, hw)
    o_ref[...] = part[None]


def _tv_kernel_rows(x_ref, mv_ref, mh_ref, o_ref, *, ragged, total_rows):
    """Row-layout path (large images): x_ref is (imgs_per_tile*H, W)."""
    block_rows, w = x_ref.shape
    x = x_ref[...].astype(jnp.float32)
    if ragged:
        row = jax.lax.broadcasted_iota(jnp.int32, (block_rows, 1), 0)
        x = jnp.where(row + pl.program_id(0) * block_rows < total_rows, x, 0.0)
    down = pltpu.roll(x, block_rows - 1, axis=0)   # down[r]  = x[(r + 1) % rows]
    right = pltpu.roll(x, w - 1, axis=1)           # right[c] = x[(c + 1) % w]
    dh = down - x
    dw = right - x
    contrib = dh * dh * mv_ref[...] + dw * dw * mh_ref[...]
    if block_rows % 8 == 0:
        part = contrib.reshape(block_rows // 8, 8, w).sum(axis=0)    # (8, w)
    else:
        part = contrib.sum(axis=0, keepdims=True)                    # (1, w)
    o_ref[...] = part[None]


def total_variation_loss(x: jax.Array, loss_weight: float = 1.0,
                         force_layout: str | None = None) -> jax.Array:
    """x: (B, C, H, W) -> scalar TV loss (matches the PyTorch module).

    Note: H == 1 or W == 1 gives count_* == 0; like the reference this yields
    a NaN result (0/0), produced here via 0 * inf inside the folded masks.
    """
    B, C, H, W = x.shape
    hw = H * W
    n_imgs = B * C
    count_h = C * (H - 1) * W
    count_w = C * H * (W - 1)
    # jnp division so count == 0 gives inf (not a Python ZeroDivisionError).
    scale_h = jnp.float32(2.0 * loss_weight) / jnp.float32(count_h * B)
    scale_w = jnp.float32(2.0 * loss_weight) / jnp.float32(count_w * B)

    vmem_cap = _vmem_capacity_bytes()
    # Scoped limit: half of physical, capped at 64 MiB (32 MiB on v7x).
    vmem_limit = int(min(vmem_cap // 2, 64 * 1024 * 1024))
    budget = vmem_limit // 2  # headroom for compiler scratch / double-buffering

    use_flat = force_layout != "rows"
    if force_layout is None:
        use_flat = min(n_imgs, 8) * hw * _WORKSET_BYTES_PER_ELEM <= budget

    if use_flat:
        # ---------- lane-dense layout: one image per row, H*W on lanes ------
        block_rows = (budget // (hw * _WORKSET_BYTES_PER_ELEM)) // 8 * 8
        block_rows = max(block_rows, 8)
        if n_imgs > 8:
            # >= 2 grid steps so the "parallel" axis can span both v7x TCs.
            block_rows = min(block_rows, _round_up(_ceil_div(n_imgs, 2), 8))
        block_rows = min(block_rows, n_imgs)
        num_tiles = _ceil_div(n_imgs, block_rows)
        ragged = (n_imgs % block_rows) != 0
        out_rows = 8 if block_rows % 8 == 0 else 1

        col = jnp.arange(hw, dtype=jnp.int32)
        mask_h = (col < (H - 1) * W).astype(jnp.float32) * scale_h
        mask_w = ((col % W) != (W - 1)).astype(jnp.float32) * scale_w
        masks = jnp.stack([mask_h, mask_w], axis=0)          # (2, hw) resident

        kernel = functools.partial(_tv_kernel_flat, w=W, ragged=ragged,
                                   n_rows=n_imgs)
        parts = pl.pallas_call(
            kernel,
            grid=(num_tiles,),
            in_specs=[
                pl.BlockSpec((block_rows, hw), lambda i: (i, 0)),
                pl.BlockSpec((2, hw), lambda i: (0, 0)),       # VMEM-resident
            ],
            out_specs=pl.BlockSpec((1, out_rows, hw), lambda i: (i, 0, 0)),
            out_shape=jax.ShapeDtypeStruct((num_tiles, out_rows, hw),
                                           jnp.float32),
            compiler_params=pltpu.CompilerParams(
                dimension_semantics=("parallel",),
                vmem_limit_bytes=vmem_limit),
        )(x.reshape(n_imgs, hw), masks)
    else:
        # ---------- row layout for large images: (B*C*H, W), whole images ----
        # TODO(synk): an image whose single-image f32 working set still exceeds
        # the VMEM budget would need halo-tiling of H; not implemented.
        rb_min = 8 // math.gcd(H, 8)   # smallest image count with rb*H % 8 == 0
        rb = (budget // (hw * _WORKSET_BYTES_PER_ELEM)) // rb_min * rb_min
        rb = max(rb, rb_min)
        if n_imgs > rb_min:
            rb = min(rb, _round_up(_ceil_div(n_imgs, 2), rb_min))
        rb = min(rb, n_imgs)
        block_rows = rb * H
        total_rows = n_imgs * H
        num_tiles = _ceil_div(n_imgs, rb)
        ragged = (n_imgs % rb) != 0
        out_rows = 8 if block_rows % 8 == 0 else 1

        r = jnp.arange(block_rows, dtype=jnp.int32)
        mask_v = (((r % H) != (H - 1)).astype(jnp.float32) * scale_h
                  ).reshape(block_rows, 1)
        c = jnp.arange(W, dtype=jnp.int32)
        mask_z = ((c != (W - 1)).astype(jnp.float32) * scale_w).reshape(1, W)

        kernel = functools.partial(_tv_kernel_rows, ragged=ragged,
                                   total_rows=total_rows)
        parts = pl.pallas_call(
            kernel,
            grid=(num_tiles,),
            in_specs=[
                pl.BlockSpec((block_rows, W), lambda i: (i, 0)),
                pl.BlockSpec((block_rows, 1), lambda i: (0, 0)),   # resident
                pl.BlockSpec((1, W), lambda i: (0, 0)),            # resident
            ],
            out_specs=pl.BlockSpec((1, out_rows, W), lambda i: (i, 0, 0)),
            out_shape=jax.ShapeDtypeStruct((num_tiles, out_rows, W),
                                           jnp.float32),
            compiler_params=pltpu.CompilerParams(
                dimension_semantics=("parallel",),
                vmem_limit_bytes=vmem_limit),
        )(x.reshape(total_rows, W), mask_v, mask_z)

    # Scales are folded into the masks, so the epilogue is a single reduction.
    return jnp.sum(parts)


def _reference(x, loss_weight=1.0):
    B, C, H, W = x.shape
    count_h = C * (H - 1) * W
    count_w = C * H * (W - 1)
    xf = x.astype(jnp.float32)
    h_tv = jnp.sum((xf[:, :, 1:, :] - xf[:, :, :-1, :]) ** 2)
    w_tv = jnp.sum((xf[:, :, :, 1:] - xf[:, :, :, :-1]) ** 2)
    return loss_weight * 2.0 * (h_tv / count_h + w_tv / count_w) / B


if __name__ == "__main__":
    key = jax.random.PRNGKey(0)
    x = jax.random.normal(key, (2, 4, 16, 16), dtype=jnp.float32)

    # Single-tile, lane-dense path.
    loss = total_variation_loss(x, loss_weight=1.0)
    jax.block_until_ready(loss)
    ref = _reference(x, 1.0)
    assert jnp.allclose(loss, ref, rtol=1e-5, atol=1e-5), (loss, ref)

    # Multi-tile + ragged-tail path (B*C = 20 rows -> 2 tiles of 16, tail of 4).
    x2 = jax.random.normal(jax.random.PRNGKey(1), (5, 4, 16, 16),
                           dtype=jnp.float32)
    loss2 = total_variation_loss(x2, loss_weight=0.5)
    jax.block_until_ready(loss2)
    ref2 = _reference(x2, 0.5)
    assert jnp.allclose(loss2, ref2, rtol=1e-5, atol=1e-5), (loss2, ref2)

    # bf16 streaming (native-dtype HBM traffic, f32 in-register accumulation).
    x_bf = x2.astype(jnp.bfloat16)
    loss3 = total_variation_loss(x_bf, loss_weight=1.0)
    jax.block_until_ready(loss3)
    ref3 = _reference(x_bf, 1.0)
    assert jnp.allclose(loss3, ref3, rtol=1e-3, atol=1e-3), (loss3, ref3)

    # Row-layout (large-image fallback) path, forced at a small shape.
    loss4 = total_variation_loss(x2, loss_weight=0.7, force_layout="rows")
    jax.block_until_ready(loss4)
    ref4 = _reference(x2, 0.7)
    assert jnp.allclose(loss4, ref4, rtol=1e-5, atol=1e-5), (loss4, ref4)

    print("KERNEL_OK")
</pallas_src>

<mosaic_0001>
module attributes {stable_mosaic.version = 11 : i64} {
  func.func @_tv_kernel_flat(%arg0: i32, %arg1: memref<8x256xf32, #tpu.memory_space<vmem>>, %arg2: memref<2x256xf32, #tpu.memory_space<vmem>>, %arg3: memref<1x8x256xf32, #tpu.memory_space<vmem>>) attributes {dimension_semantics = [#tpu.dimension_semantics<parallel>], iteration_bounds = array<i64: 1>, scalar_prefetch = 0 : i64, scratch_operands = 0 : i64, tpu.core_type = #tpu.core_type<tc>, window_params = [{transform_indices = @transform_0, window_bounds = array<i64: 8, 256>}, {pipeline_mode = #tpu.pipeline_mode<synchronous>, transform_indices = @transform_1, window_bounds = array<i64: 2, 256>}, {transform_indices = @transform_2, window_bounds = array<i64: 1, 8, 256>}]} {
    %c0 = arith.constant 0 : index
    %c0_0 = arith.constant 0 : index
    %0 = vector.load %arg1[%c0, %c0_0] : memref<8x256xf32, #tpu.memory_space<vmem>>, vector<8x256xf32>
    %c0_1 = arith.constant 0 : index
    %c0_2 = arith.constant 0 : index
    %1 = vector.load %arg2[%c0_1, %c0_2] : memref<2x256xf32, #tpu.memory_space<vmem>>, vector<2x256xf32>
    %c240_i32 = arith.constant 240 : i32
    %2 = tpu.dynamic_rotate %0 by %c240_i32 dim 1 : vector<8x256xf32>, i32 -> vector<8x256xf32>
    %c255_i32 = arith.constant 255 : i32
    %3 = tpu.dynamic_rotate %0 by %c255_i32 dim 1 : vector<8x256xf32>, i32 -> vector<8x256xf32>
    %4 = arith.subf %2, %0 : vector<8x256xf32>
    %5 = arith.subf %3, %0 : vector<8x256xf32>
    %6 = arith.mulf %4, %4 : vector<8x256xf32>
    %7 = vector.extract_strided_slice %1 {offsets = [0, 0], sizes = [1, 256], strides = [1, 1]} : vector<2x256xf32> to vector<1x256xf32>
    %8 = vector.broadcast %7 : vector<1x256xf32> to vector<8x256xf32>
    %9 = arith.mulf %6, %8 : vector<8x256xf32>
    %10 = arith.mulf %5, %5 : vector<8x256xf32>
    %11 = vector.extract_strided_slice %1 {offsets = [1, 0], sizes = [1, 256], strides = [1, 1]} : vector<2x256xf32> to vector<1x256xf32>
    %12 = vector.broadcast %11 : vector<1x256xf32> to vector<8x256xf32>
    %13 = arith.mulf %10, %12 : vector<8x256xf32>
    %14 = arith.addf %9, %13 : vector<8x256xf32>
    %15 = vector.shape_cast %14 : vector<8x256xf32> to vector<1x8x256xf32>
    %cst = arith.constant dense<0.000000e+00> : vector<8x256xf32>
    %16 = vector.multi_reduction <add>, %15, %cst [0] : vector<1x8x256xf32> to vector<8x256xf32>
    %17 = vector.shape_cast %16 : vector<8x256xf32> to vector<1x8x256xf32>
    %c0_3 = arith.constant 0 : index
    %c0_4 = arith.constant 0 : index
    %c0_5 = arith.constant 0 : index
    %18 = vector.load %arg3[%c0_3, %c0_4, %c0_5] : memref<1x8x256xf32, #tpu.memory_space<vmem>>, vector<1x8x256xf32>
    tpu.vector_store %arg3[%c0_3, %c0_4, %c0_5], %17 {strides = array<i32>} : memref<1x8x256xf32, #tpu.memory_space<vmem>>, vector<1x8x256xf32>,
    return
  }
  func.func @transform_0(%arg0: i32) -> (i32, i32) {
    %c0_i32 = arith.constant 0 : i32
    %c0_i32_0 = arith.constant 0 : i32
    return %arg0, %c0_i32 : i32, i32
  }
  func.func @transform_1(%arg0: i32) -> (i32, i32) {
    %c0_i32 = arith.constant 0 : i32
    %c0_i32_0 = arith.constant 0 : i32
    %c0_i32_1 = arith.constant 0 : i32
    return %c0_i32, %c0_i32_0 : i32, i32
  }
  func.func @transform_2(%arg0: i32) -> (i32, i32, i32) {
    %c0_i32 = arith.constant 0 : i32
    %c0_i32_0 = arith.constant 0 : i32
    %c0_i32_1 = arith.constant 0 : i32
    return %arg0, %c0_i32, %c0_i32_0 : i32, i32, i32
  }
}

</mosaic_0001>

<bundles_post_ra>
// kernel: tpu_custom_call.1
= control target key start
LH: loop header
LB: loop body
LE: loop exit
PB: predicated region body
PF: predicated region fallthrough
CT: control target
= control target key end

     0   :  { %7 = vsyncpa [#allocation3], 0  ;;  %s226_s0 = inlined_call_operand.hbm [shape: f32[8,256], index: 0, kind: input, shape index: {}]   ;;  %s227_s1 = inlined_call_operand.hbm [shape: f32[2,256], index: 1, kind: input, shape index: {}]   ;;  %s228_s2 = inlined_call_operand.hbm [shape: f32[1,8,256], index: 2, kind: output, shape index: {}]  }
   0x1   :  { %8 = vsyncpa [#allocation6], 0 }
   0x2   :  { %9 = vsyncpa [#allocation4], 0  ;;  %s197_s9 = smov [#allocation2]   ;;  %s198_s11 = smov [#allocation5]  }
   0x3   :  { %s16_s10 = sshll.u32 %s197_s9, 4  ;;  %s26_s12 = sshll.u32 %s198_s11, 4  ;;  %s17_s10 = int_to_ptr.vmem [resolvable:$true] %s16_s10  ;;  %s27_s12 = int_to_ptr.vmem [resolvable:$true] %s26_s12 }
   0x4   :  { %s139_s13 = scalar_lea.vmem %s17_s10, 256  ;;  %p144_p1 = scmp.lt.s32.totalorder %s17_s10, %s17_s10 }
   0x5   :  { %p140_p0 = scmp.ne.s32.totalorder %s17_s10, %s139_s13  ;;  %p145_p2 = scmp.lt.s32.totalorder %s139_s13, %s139_s13 }
   0x7   :  { %p146_p3 = por %p145_p2, %p144_p1 }
   0x9   :  { %p147_p4 = pnand %p146_p3, %p140_p0 }
   0xb   :  { %150 = shalt.err (!%p147_p4)
}
   0xc   :  { %19 = dma.hbm_to_vmem [thread:$0]  %s226_s0, 256, %s17_s10, [#allocation3]  }
   0xd   :  { %s159_s16 = scalar_lea.vmem %s27_s12, 64  ;;  %p164_p6 = scmp.lt.s32.totalorder %s27_s12, %s27_s12 }
   0xe   :  { %p160_p5 = scmp.ne.s32.totalorder %s27_s12, %s159_s16  ;;  %p165_p7 = scmp.lt.s32.totalorder %s159_s16, %s159_s16 }
  0x10   :  { %p166_p8 = por %p165_p7, %p164_p6 }
  0x12   :  { %p167_p9 = pnand %p166_p8, %p160_p5 }
  0x14   :  { %170 = shalt.err (!%p167_p9)
}
  0x15   :  { %29 = dma.hbm_to_vmem [thread:$0]  %s227_s1, 64, %s27_s12, [#allocation6]  }
  0x16   :  { %191 = dma.done.wait [#allocation3], 256  }
  0x17   :  { %192 = vsyncadd [#allocation3], 4294967040 }
  0x18   :  { %193 = dma.done.wait [#allocation6], 64  }
  0x19   :  { %194 = vsyncadd [#allocation6], 4294967232  ;;  %v36_v0 = vld [vmem:[#allocation2] sm:$0xff]  ;;  %s199_s19 = smov 127   ;;  %s200_s20 = smov 112   ;;  %v37_v1 = vld [vmem:[#allocation2 + $0x8] sm:$0xff]  ;;  %v43_v2 = vlaneseq }
  0x1a   :  { %48 = vrot.lane.b32.xlu1 %v36_v0, %s199_s19  ;;  %39 = vrot.lane.b32.xlu0 %v36_v0, %s200_s20  ;;  %v38_v8 = vld [vmem:[#allocation5] sm:$0xf]  ;;  %s201_s0 = smov [#allocation7]  }
  0x1b   :  { %v63_v3 = vshrl.u32 %v43_v2, 7  ;;  %v44_v9 = vand.u32 127, %v43_v2  ;;  %s116_s1 = sshll.u32 %s201_s0, 4  ;;  %s117_s1 = int_to_ptr.vmem [resolvable:$true] %s116_s1 }
  0x1c   :  { %s171_s21 = scalar_lea.vmem %s117_s1, 256  ;;  %p176_p11 = scmp.lt.s32.totalorder %s117_s1, %s117_s1 }
  0x1d   :  { %v86_v4 = vsub.s32 1, %v63_v3  ;;  %v90_v5 = vsub.s32 3, %v63_v3  ;;  %v64_v6 = vsub.s32 0, %v63_v3  ;;  %v68_v7 = vsub.s32 2, %v63_v3  ;;  %p172_p10 = scmp.ne.s32.totalorder %s117_s1, %s171_s21  ;;  %p177_p12 = scmp.lt.s32.totalorder %s171_s21, %s171_s21 }
  0x1e   :  { %50 = vrot.lane.b32.xlu1 %v37_v1, %s199_s19  ;;  %41 = vrot.lane.b32.xlu0 %v37_v1, %s200_s20  ;;  %vm52_vm0 = vcmp.lt.s32.totalorder %v44_v9, 127  ;;  %vm45_vm1 = vcmp.lt.s32.totalorder %v44_v9, 112 }
  0x1f   :  { %v87_v12 = vrot.slane %v38_v8, %v86_v4  ;;  %v91_v13 = vrot.slane %v38_v8, %v90_v5  ;;  %v65_v14 = vrot.slane %v38_v8, %v64_v6  ;;  %v69_v15 = vrot.slane %v38_v8, %v68_v7  ;;  %p178_p13 = por %p177_p12, %p176_p11 }
  0x21   :  { %v97_v16 = vrot.slane %v87_v12, %v86_v4  ;;  %v101_v17 = vrot.slane %v91_v13, %v86_v4  ;;  %v75_v19 = vrot.slane %v65_v14, %v64_v6  ;;  %v79_v20 = vrot.slane %v69_v15, %v64_v6  ;;  %p179_p0 = pnand %p178_p13, %p172_p10 }
  0x8c   :  { %v49_v10 = vpop.permute.xlu1 %48  ;;  %v40_v11 = vpop.permute.xlu0 %39 }
  0x90   :  { %v51_v18 = vpop.permute.xlu1 %50  ;;  %v42_v21 = vpop.permute.xlu0 %41 }
  0x91   :  { %v53_v22 = vsel %vm52_vm0, %v49_v10, %v51_v18  ;;  %v54_v23 = vsel %vm52_vm0, %v51_v18, %v49_v10  ;;  %v46_v24 = vsel %vm45_vm1, %v40_v11, %v42_v21  ;;  %v47_v25 = vsel %vm45_vm1, %v42_v21, %v40_v11 }
  0x92   :  { %v57_v26 = vsub.f32 %v53_v22, %v36_v0  ;;  %v58_v27 = vsub.f32 %v54_v23, %v37_v1  ;;  %v55_v28 = vsub.f32 %v46_v24, %v36_v0  ;;  %v56_v29 = vsub.f32 %v47_v25, %v37_v1 }
  0x94   :  { %v82_v30 = vmul.f32 %v57_v26, %v57_v26  ;;  %v83_v31 = vmul.f32 %v58_v27, %v58_v27  ;;  %v59_v32 = vmul.f32 %v55_v28, %v55_v28  ;;  %v60_v33 = vmul.f32 %v56_v29, %v56_v29 }
  0x96   :  { %v102_v34 = vmul.f32 %v97_v16, %v82_v30  ;;  %v103_v35 = vmul.f32 %v101_v17, %v83_v31  ;;  %v80_v36 = vmul.f32 %v75_v19, %v59_v32  ;;  %v81_v37 = vmul.f32 %v79_v20, %v60_v33 }
  0x98   :  { %v104_v38 = vadd.f32 %v102_v34, %v80_v36  ;;  %v105_v39 = vadd.f32 %v103_v35, %v81_v37 }
  0x9a   :  { %108 = vst [vmem:[#allocation7] sm:$0xff] %v104_v38  ;;  %109 = vst [vmem:[#allocation7 + $0x8] sm:$0xff] %v105_v39 }
  0x9b   :  { %182 = shalt.err (!%p179_p0)
}
  0x9c   :  { %119 = dma.vmem_to_hbm [thread:$0]  %s117_s1, 256, %s228_s2, [#allocation4]  }
  0x9d   :  { %195 = dma.done.wait [#allocation4], 256  }
  0x9e   :  { %196 = vsyncadd [#allocation4], 4294967040 }
  0x9f   :  { %123 = vsyncpa [#allocation3], 1 }
  0xa0   :  { %124 = vsyncpa [#allocation6], 1 }
  0xa1   :  { %125 = vsyncpa [#allocation4], 1 }

</bundles_post_ra>
